<compile_context>
chip_gen: v7x
topology: tpu7x:2x2x1
jax: 0.10.0
libtpu: 0.0.40
codegen_flags: <defaults>
</compile_context>

<pallas_src>
import functools

import jax
import jax.numpy as jnp
from jax.experimental import pallas as pl
from jax.experimental.pallas import tpu as pltpu


_LANE_COLS = 512                      # lane-dense slab width (multiple of 128)
_TARGET_BLOCK_BYTES = 2 * 1024 * 1024 # ~2 MiB per block: fits all generations


def _round_up(x, m):
    return ((x + m - 1) // m) * m


def _general_relu_kernel(x_ref, o_ref, *, leak, sub, maxv):
    x = x_ref[...]
    if leak is not None:
        # F.leaky_relu(x, leak): x if x >= 0 else leak * x
        y = jnp.where(x >= 0, x, x * jnp.asarray(leak, x.dtype))
    else:
        y = jnp.maximum(x, jnp.zeros((), x.dtype))
    if sub is not None:
        y = y - jnp.asarray(sub, x.dtype)
    if maxv is not None:
        y = jnp.minimum(y, jnp.asarray(maxv, x.dtype))
    o_ref[...] = y


def general_relu(x, leak=None, sub=None, maxv=None):
    """Elementwise GeneralRelu on an arbitrary-shaped array (e.g. NCHW)."""
    orig_shape = x.shape
    dtype = x.dtype
    total = x.size
    itemsize = jnp.dtype(dtype).itemsize

    # dtype-aware sublane packing: 8 rows/vreg for 32-bit, 16 for bf16, 32 for int8.
    sublane = max(8, 32 // itemsize)

    cols = _LANE_COLS

    # Flatten and pad to a multiple of the lane width (lane-dense, unmasked
    # stores everywhere except possibly the last row-block).
    flat = x.reshape(-1)
    padded_total = _round_up(total, cols)
    if padded_total != total:
        flat = jnp.pad(flat, (0, padded_total - total))
    rows = padded_total // cols
    x2d = flat.reshape(rows, cols)

    # ~2 MiB blocks, tile_rows a multiple of the dtype's sublane packing,
    # clamped so we never ask for a block wildly larger than the array.
    tile_rows = (_TARGET_BLOCK_BYTES // (cols * itemsize)) // sublane * sublane
    tile_rows = max(sublane, tile_rows)
    tile_rows = min(tile_rows, _round_up(rows, sublane))

    grid = (pl.cdiv(rows, tile_rows),)  # partial last block is masked by Pallas

    kernel = functools.partial(_general_relu_kernel, leak=leak, sub=sub, maxv=maxv)

    out2d = pl.pallas_call(
        kernel,
        out_shape=jax.ShapeDtypeStruct((rows, cols), dtype),
        grid=grid,
        in_specs=[pl.BlockSpec((tile_rows, cols), lambda i: (i, 0))],
        out_specs=pl.BlockSpec((tile_rows, cols), lambda i: (i, 0)),
        compiler_params=pltpu.CompilerParams(
            dimension_semantics=("parallel",),
        ),
    )(x2d)

    out_flat = out2d.reshape(-1)
    if padded_total != total:
        out_flat = out_flat[:total]
    return out_flat.reshape(orig_shape)


def general_relu_ref(x, leak=None, sub=None, maxv=None):
    """Pure-JAX reference matching the PyTorch forward."""
    if leak is not None:
        y = jnp.where(x >= 0, x, x * jnp.asarray(leak, x.dtype))
    else:
        y = jnp.maximum(x, jnp.zeros((), x.dtype))
    if sub is not None:
        y = y - jnp.asarray(sub, x.dtype)
    if maxv is not None:
        y = jnp.minimum(y, jnp.asarray(maxv, x.dtype))
    return y.astype(x.dtype)


if __name__ == "__main__":
    key = jax.random.PRNGKey(0)
    leak, sub, maxv = 0.1, 0.4, 6.0

    # NCHW input, small shape consistent with a conv activation.
    x = jax.random.normal(key, (2, 4, 16, 16), dtype=jnp.float32)

    # Full GeneralRelu(leak, sub, maxv) path.
    out = jax.block_until_ready(general_relu(x, leak=leak, sub=sub, maxv=maxv))
    ref = general_relu_ref(x, leak=leak, sub=sub, maxv=maxv)
    assert out.shape == x.shape and out.dtype == x.dtype
    assert jnp.allclose(out, ref, atol=1e-6, rtol=1e-6)

    # Plain-ReLU path (leak=None, no sub/maxv).
    out2 = jax.block_until_ready(general_relu(x))
    assert jnp.allclose(out2, general_relu_ref(x), atol=1e-6, rtol=1e-6)

    # Non-multiple-of-128 total -> exercises the pad + masked-last-block path.
    key, k2 = jax.random.split(key)
    x_odd = jax.random.normal(k2, (3, 5, 7, 9), dtype=jnp.float32)  # 945 elems
    out3 = jax.block_until_ready(general_relu(x_odd, leak=leak, sub=sub, maxv=maxv))
    ref3 = general_relu_ref(x_odd, leak=leak, sub=sub, maxv=maxv)
    assert out3.shape == x_odd.shape
    assert jnp.allclose(out3, ref3, atol=1e-6, rtol=1e-6)

    # bf16 -> exercises the dtype-aware sublane tiling path.
    x_bf = x.astype(jnp.bfloat16)
    out4 = jax.block_until_ready(general_relu(x_bf, leak=leak, sub=sub, maxv=maxv))
    ref4 = general_relu_ref(x_bf, leak=leak, sub=sub, maxv=maxv)
    assert out4.dtype == jnp.bfloat16
    assert jnp.allclose(out4.astype(jnp.float32), ref4.astype(jnp.float32),
                        atol=5e-2, rtol=5e-2)

    print("KERNEL_OK")
</pallas_src>

<mosaic_0001>
module attributes {stable_mosaic.version = 11 : i64} {
  func.func @_general_relu_kernel(%arg0: i32, %arg1: memref<8x512xf32, #tpu.memory_space<vmem>>, %arg2: memref<8x512xf32, #tpu.memory_space<vmem>>) attributes {dimension_semantics = [#tpu.dimension_semantics<parallel>], iteration_bounds = array<i64: 1>, scalar_prefetch = 0 : i64, scratch_operands = 0 : i64, tpu.core_type = #tpu.core_type<tc>, window_params = [{transform_indices = @transform_0, window_bounds = array<i64: 8, 512>}, {transform_indices = @transform_1, window_bounds = array<i64: 8, 512>}]} {
    %c0 = arith.constant 0 : index
    %c0_0 = arith.constant 0 : index
    %0 = vector.load %arg1[%c0, %c0_0] : memref<8x512xf32, #tpu.memory_space<vmem>>, vector<8x512xf32>
    %cst = arith.constant 0.000000e+00 : f32
    %1 = vector.broadcast %cst : f32 to vector<8x512xf32>
    %2 = arith.cmpf oge, %0, %1 : vector<8x512xf32>
    %cst_1 = arith.constant 1.000000e-01 : f32
    %3 = vector.broadcast %cst_1 : f32 to vector<8x512xf32>
    %4 = arith.mulf %0, %3 : vector<8x512xf32>
    %5 = arith.select %2, %0, %4 : vector<8x512xi1>, vector<8x512xf32>
    %cst_2 = arith.constant 4.000000e-01 : f32
    %6 = vector.broadcast %cst_2 : f32 to vector<8x512xf32>
    %7 = arith.subf %5, %6 : vector<8x512xf32>
    %cst_3 = arith.constant 6.000000e+00 : f32
    %8 = vector.broadcast %cst_3 : f32 to vector<8x512xf32>
    %9 = arith.minimumf %7, %8 : vector<8x512xf32>
    %c0_4 = arith.constant 0 : index
    %c0_5 = arith.constant 0 : index
    %10 = vector.load %arg2[%c0_4, %c0_5] : memref<8x512xf32, #tpu.memory_space<vmem>>, vector<8x512xf32>
    tpu.vector_store %arg2[%c0_4, %c0_5], %9 {strides = array<i32>} : memref<8x512xf32, #tpu.memory_space<vmem>>, vector<8x512xf32>,
    return
  }
  func.func @transform_0(%arg0: i32) -> (i32, i32) {
    %c0_i32 = arith.constant 0 : i32
    %c0_i32_0 = arith.constant 0 : i32
    return %arg0, %c0_i32 : i32, i32
  }
  func.func @transform_1(%arg0: i32) -> (i32, i32) {
    %c0_i32 = arith.constant 0 : i32
    %c0_i32_0 = arith.constant 0 : i32
    return %arg0, %c0_i32 : i32, i32
  }
}

</mosaic_0001>

<bundles_post_ra>
// kernel: tpu_custom_call.1
= control target key start
LH: loop header
LB: loop body
LE: loop exit
PB: predicated region body
PF: predicated region fallthrough
CT: control target
= control target key end

     0   :  { %6 = vsyncpa [#allocation3], 0  ;;  %s168_s0 = inlined_call_operand.hbm [shape: f32[4,512], index: 0, kind: input, shape index: {}]   ;;  %s169_s1 = inlined_call_operand.hbm [shape: f32[4,512], index: 1, kind: output, shape index: {}]  }
   0x1   :  { %7 = vsyncpa [#allocation4], 0 }
   0x2   :  { %12 = vsyncadd [#allocation3], 256  ;;  %s124_s6 = smov [#allocation2]   ;;  %s76_s10 = scalar_lea.hbm %s168_s0, 256 }
   0x3   :  { %s13_s7 = sshll.u32 %s124_s6, 4  ;;  %p77_p0 = scmp.ne.s32.totalorder %s168_s0, %s76_s10  ;;  %s14_s7 = int_to_ptr.vmem [resolvable:$true] %s13_s7 }
   0x4   :  { %p80_p1 = scmp.lt.u32.totalorder %s76_s10, %s168_s0 }
   0x6   :  { %p82_p2 = pnand %p80_p1, %p77_p0 }
   0x8   :  { %85 = shalt.err (!%p82_p2)
}
   0x9   :  { %s86_s15 = scalar_lea.vmem %s14_s7, 256  ;;  %s90_s16 = scalar_lea.vmem %s14_s7, 512 }
   0xa   :  { %p87_p3 = scmp.ne.s32.totalorder %s14_s7, %s86_s15  ;;  %p91_p4 = scmp.lt.s32.totalorder %s14_s7, %s14_s7 }
   0xb   :  { %p92_p5 = scmp.lt.s32.totalorder %s90_s16, %s86_s15 }
   0xd   :  { %p93_p6 = por %p92_p5, %p91_p4 }
   0xf   :  { %p94_p7 = pnand %p93_p6, %p87_p3 }
  0x11   :  { %97 = shalt.err (!%p94_p7)
}
  0x12   :  { %s125_s17 = smov 256   ;;  %s126_s18 = smov 16  }
  0x13   :  { %19 = dma.hbm_to_vmem [thread:$0]  %s168_s0, 256, %s14_s7, [#allocation3], %s125_s17, %s125_s17, %s126_s18  }
  0x14   :  { %120 = dma.done.wait [#allocation3], 512  }
  0x15   :  { %121 = vsyncadd [#allocation3], 4294966784  ;;  %v23_v0 = vld [vmem:[#allocation2] sm:$0xff]  ;;  %v24_v1 = vld [vmem:[#allocation2 + $0x8] sm:$0xff] }
  0x16   :  { %v25_v2 = vld [vmem:[#allocation2 + $0x10] sm:$0xff]  ;;  %vm27_vm0 = vcmp.ge.f32.partialorder %v23_v0, 0.0  ;;  %v31_v3 = vmul.f32 0.1, %v23_v0  ;;  %vm28_vm1 = vcmp.ge.f32.partialorder %v24_v1, 0.0  ;;  %v26_v6 = vld [vmem:[#allocation2 + $0x18] sm:$0xff] }
  0x17   :  { %v32_v4 = vmul.f32 0.1, %v24_v1  ;;  %vm29_vm2 = vcmp.ge.f32.partialorder %v25_v2, 0.0  ;;  %v33_v5 = vmul.f32 0.1, %v25_v2  ;;  %vm30_vm3 = vcmp.ge.f32.partialorder %v26_v6, 0.0 }
  0x18   :  { %v35_v7 = vsel %vm27_vm0, %v23_v0, %v31_v3  ;;  %v34_v9 = vmul.f32 0.1, %v26_v6 }
  0x19   :  { %v36_v8 = vsel %vm28_vm1, %v24_v1, %v32_v4  ;;  %v68_v10 = vadd.f32 -0.4, %v35_v7  ;;  %v37_v12 = vsel %vm29_vm2, %v25_v2, %v33_v5 }
  0x1a   :  { %v69_v11 = vadd.f32 -0.4, %v36_v8  ;;  %v70_v13 = vadd.f32 -0.4, %v37_v12  ;;  %v38_v14 = vsel %vm30_vm3, %v26_v6, %v34_v9 }
  0x1b   :  { %v43_v15 = vmin.f32 %v68_v10, 6.0  ;;  %v71_v17 = vadd.f32 -0.4, %v38_v14 }
  0x1c   :  { %v44_v16 = vmin.f32 %v69_v11, 6.0  ;;  %v45_v18 = vmin.f32 %v70_v13, 6.0 }
  0x1d   :  { %47 = vst [vmem:[#allocation5] sm:$0xff] %v43_v15  ;;  %v46_v19 = vmin.f32 %v71_v17, 6.0 }
  0x1e   :  { %48 = vst [vmem:[#allocation5 + $0x8] sm:$0xff] %v44_v16  ;;  %49 = vst [vmem:[#allocation5 + $0x10] sm:$0xff] %v45_v18 }
  0x1f   :  { %50 = vst [vmem:[#allocation5 + $0x18] sm:$0xff] %v46_v19 }
  0x20   :  { %55 = vsyncadd [#allocation4], 256  ;;  %s127_s0 = smov [#allocation5]  }
  0x21   :  { %s56_s21 = sshll.u32 %s127_s0, 4  ;;  %s57_s21 = int_to_ptr.vmem [resolvable:$true] %s56_s21 }
  0x22   :  { %s98_s22 = scalar_lea.vmem %s57_s21, 256  ;;  %s102_s23 = scalar_lea.vmem %s57_s21, 512 }
  0x23   :  { %p99_p8 = scmp.ne.s32.totalorder %s57_s21, %s98_s22  ;;  %p103_p9 = scmp.lt.s32.totalorder %s57_s21, %s57_s21 }
  0x24   :  { %p104_p10 = scmp.lt.s32.totalorder %s102_s23, %s98_s22 }
  0x26   :  { %p105_p11 = por %p104_p10, %p103_p9 }
  0x28   :  { %p106_p12 = pnand %p105_p11, %p99_p8 }
  0x2a   :  { %109 = shalt.err (!%p106_p12)
}
  0x2b   :  { %s110_s26 = scalar_lea.hbm %s169_s1, 256 }
  0x2c   :  { %p111_p13 = scmp.ne.s32.totalorder %s169_s1, %s110_s26  ;;  %p114_p0 = scmp.lt.u32.totalorder %s110_s26, %s169_s1 }
  0x2e   :  { %p116_p1 = pnand %p114_p0, %p111_p13 }
  0x30   :  { %119 = shalt.err (!%p116_p1)
}
  0x31   :  { %62 = dma.vmem_to_hbm [thread:$0]  %s57_s21, 256, %s169_s1, [#allocation4], %s125_s17, %s125_s17, %s126_s18  }
  0x32   :  { %122 = dma.done.wait [#allocation4], 512  }
  0x33   :  { %123 = vsyncadd [#allocation4], 4294966784 }
  0x34   :  { %66 = vsyncpa [#allocation3], 1 }
  0x35   :  { %67 = vsyncpa [#allocation4], 1 }

</bundles_post_ra>
